<compile_context>
chip_gen: v6e
topology: v6e:2x2x1
jax: 0.10.0
libtpu: 0.0.40
codegen_flags: <defaults>
</compile_context>

<pallas_src>
import jax
import jax.numpy as jnp
from jax.experimental import pallas as pl
from jax.experimental.pallas import tpu as pltpu

_LANE = 128


def _round_up(n, m):
    return ((n + m - 1) // m) * m


def _cdiv(a, b):
    return -(-a // b)


def mlp_kernel(x_ref, w1_ref, b1_ref, w2_ref, b2_ref, w3_ref, b3_ref, o_ref):
    """One batch tile of the fused MLP.

    x_ref: (TM, Dp) activation tile (f32 or bf16).
    w*/b*: full (padded) weights/biases, VMEM-resident across the grid.
    Each matmul accumulates in f32 on the MXU; bias-add + ReLU run in f32 on
    the VPU; the result is cast once to the compute dtype before feeding the
    next MXU push.  Intermediates never round-trip through VMEM scratch.
    Only the first C logit columns are stored (narrow output).
    """
    x = x_ref[...]

    h1 = jnp.dot(x, w1_ref[...], preferred_element_type=jnp.float32)
    h1 = jnp.maximum(h1 + b1_ref[...], 0.0).astype(w2_ref.dtype)

    h2 = jnp.dot(h1, w2_ref[...], preferred_element_type=jnp.float32)
    h2 = jnp.maximum(h2 + b2_ref[...], 0.0).astype(w3_ref.dtype)

    out = jnp.dot(h2, w3_ref[...], preferred_element_type=jnp.float32) + b3_ref[...]
    o_ref[...] = out[:, : o_ref.shape[1]].astype(o_ref.dtype)


def prepare_params(params, compute_dtype=jnp.bfloat16):
    """One-time pad+cast of weights/biases to lane-aligned, MXU-ready shapes.

    Hoisted out of the per-call path so a forward pass only pads/casts x.
    Biases stay f32 (added to the f32 accumulator); zero padding keeps padded
    columns exactly zero so they never leak into real outputs.
    """
    w1, b1 = params["w1"], params["b1"]
    w2, b2 = params["w2"], params["b2"]
    w3, b3 = params["w3"], params["b3"]

    D, H = w1.shape
    H2 = w2.shape[1]
    C = w3.shape[1]
    Dp, Hp, H2p, Cp = (_round_up(d, _LANE) for d in (D, H, H2, C))

    pad2 = lambda a, r, c: jnp.pad(a, ((0, r - a.shape[0]), (0, c - a.shape[1])))

    return {
        "w1": pad2(w1, Dp, Hp).astype(compute_dtype),
        "w2": pad2(w2, Hp, H2p).astype(compute_dtype),
        "w3": pad2(w3, H2p, Cp).astype(compute_dtype),
        "b1": pad2(b1, 1, Hp).astype(jnp.float32),
        "b2": pad2(b2, 1, H2p).astype(jnp.float32),
        "b3": pad2(b3, 1, Cp).astype(jnp.float32),
        "dims": (D, H, H2, C),
        "dtype": jnp.dtype(compute_dtype),
    }


def neural_net_forward(x, params, *, compute_dtype=jnp.bfloat16, tm_max=256):
    """Pallas forward equivalent to NeuralNet.forward (returns logits).

    `params` may be the raw {"w1","b1",...} dict or the output of
    prepare_params(); prefer preparing once outside for repeated calls (the
    raw path re-pads/casts the weights every call).
    """
    prepared = params if "dims" in params else prepare_params(params, compute_dtype)
    cdt = prepared["dtype"]
    D, H, H2, C = prepared["dims"]
    w1p, b1p = prepared["w1"], prepared["b1"]
    w2p, b2p = prepared["w2"], prepared["b2"]
    w3p, b3p = prepared["w3"], prepared["b3"]
    Dp, Hp = w1p.shape
    H2p = w2p.shape[1]
    Cp = w3p.shape[1]

    B = x.shape[0]
    assert x.shape[1] == D

    # Batch tiling: bf16 packs 16 sublanes/vreg -> round rows to 16 (8 for
    # f32).  Pad only to steps*TM; give large batches >=4 steps so each v7x
    # TensorCore gets >=2 pipelined iterations (also deepens the pipeline on
    # v5e/v6e at ~0.35us/step, cheaper than exposed DMA).
    row_align = 16 if cdt == jnp.dtype(jnp.bfloat16) else 8
    steps = _cdiv(B, tm_max)
    if B >= 4 * 64:
        steps = max(steps, 4)
    TM = _round_up(_cdiv(B, steps), row_align)
    Bp = steps * TM

    xp = jnp.pad(x, ((0, Bp - B), (0, Dp - D))).astype(cdt)

    in_isz = jnp.dtype(cdt).itemsize
    # VMEM budget: double-buffered x/out tiles + resident weights/biases
    # (counted 2x: default double-buffering) + headroom for any spilled
    # intermediates.  Cap at 48 MiB to leave compiler scratch room on v7x's
    # 64 MiB physical VMEM (v5e/v6e have 128 MiB so the cap is harmless).
    vmem_need = (2 * TM * Dp * in_isz
                 + 2 * TM * C * 4
                 + 2 * (Dp * Hp + Hp * H2p + H2p * Cp) * in_isz
                 + 2 * (Hp + H2p + Cp) * 4
                 + 2 * TM * (Hp + H2p) * 4)
    vmem_limit = min(48 << 20, max(int(vmem_need * 1.5) + (2 << 20), 8 << 20))

    cost = pl.CostEstimate(
        flops=2 * Bp * (Dp * Hp + Hp * H2p + H2p * Cp),
        transcendentals=0,
        bytes_accessed=(xp.size * in_isz
                        + (w1p.size + w2p.size + w3p.size) * in_isz
                        + (b1p.size + b2p.size + b3p.size) * 4
                        + Bp * C * 4),
    )

    resident = lambda a: pl.BlockSpec(a.shape, lambda i: (0, 0))

    out_padded = pl.pallas_call(
        mlp_kernel,
        out_shape=jax.ShapeDtypeStruct((Bp, C), jnp.float32),
        grid_spec=pltpu.PrefetchScalarGridSpec(
            num_scalar_prefetch=0,
            grid=(steps,),
            in_specs=[pl.BlockSpec((TM, Dp), lambda i: (i, 0)),
                      resident(w1p), resident(b1p),
                      resident(w2p), resident(b2p),
                      resident(w3p), resident(b3p)],
            out_specs=pl.BlockSpec((TM, C), lambda i: (i, 0)),
        ),
        compiler_params=pltpu.CompilerParams(
            dimension_semantics=("parallel",),
            vmem_limit_bytes=vmem_limit,
        ),
        cost_estimate=cost,
    )(xp, w1p, b1p, w2p, b2p, w3p, b3p)

    return out_padded[:B]


def init_params(key, input_size, hidden_size, num_classes):
    """Deterministic parameter init (PyTorch-like uniform fan-in scaling)."""
    h2 = hidden_size // 2
    ks = jax.random.split(key, 6)

    def lin(kw, kb, fan_in, fan_out):
        bound = 1.0 / jnp.sqrt(fan_in)
        w = jax.random.uniform(kw, (fan_in, fan_out), jnp.float32, -bound, bound)
        b = jax.random.uniform(kb, (1, fan_out), jnp.float32, -bound, bound)
        return w, b

    w1, b1 = lin(ks[0], ks[1], input_size, hidden_size)
    w2, b2 = lin(ks[2], ks[3], hidden_size, h2)
    w3, b3 = lin(ks[4], ks[5], h2, num_classes)
    return {"w1": w1, "b1": b1, "w2": w2, "b2": b2, "w3": w3, "b3": b3}


def reference_forward(x, p):
    h1 = jnp.maximum(x @ p["w1"] + p["b1"], 0.0)
    h2 = jnp.maximum(h1 @ p["w2"] + p["b2"], 0.0)
    return h2 @ p["w3"] + p["b3"]


if __name__ == "__main__":
    # Shapes consistent with the module: batch=8, input_size=32,
    # hidden_size=64 (even, as in the hidden_size grid), num_classes=10.
    B, D_IN, HIDDEN, NUM_CLASSES = 8, 32, 64, 10

    key = jax.random.PRNGKey(0)
    k_x, k_p, k_x2, k_x3 = jax.random.split(key, 4)

    x = jax.random.normal(k_x, (B, D_IN), jnp.float32)
    params = init_params(k_p, D_IN, HIDDEN, NUM_CLASSES)
    ref = reference_forward(x, params)

    # f32 path: exact-tolerance check against the pure-JAX reference.
    out_f32 = jax.block_until_ready(
        neural_net_forward(x, params, compute_dtype=jnp.float32))
    assert out_f32.shape == (B, NUM_CLASSES)
    assert jnp.allclose(out_f32, ref, atol=1e-5, rtol=1e-5)

    # Default bf16 path with one-time prepared (padded + cast) weights.
    prep_bf16 = prepare_params(params)  # bf16 weights, f32 biases
    out_bf16 = jax.block_until_ready(neural_net_forward(x, prep_bf16))
    assert out_bf16.shape == (B, NUM_CLASSES)
    assert jnp.allclose(out_bf16, ref, atol=1e-1, rtol=1e-1)

    # Larger batch: multiple pipelined grid steps, prepared f32 weights.
    prep_f32 = prepare_params(params, jnp.float32)
    B2 = 1000
    x2 = jax.random.normal(k_x2, (B2, D_IN), jnp.float32)
    out2 = jax.block_until_ready(neural_net_forward(x2, prep_f32))
    assert out2.shape == (B2, NUM_CLASSES)
    assert jnp.allclose(out2, reference_forward(x2, params), atol=1e-4, rtol=1e-4)

    # Awkward batch size exercises the steps*TM padding path (no 2x blowup).
    B3 = 513
    x3 = jax.random.normal(k_x3, (B3, D_IN), jnp.float32)
    out3 = jax.block_until_ready(neural_net_forward(x3, prep_bf16))
    assert out3.shape == (B3, NUM_CLASSES)
    assert jnp.allclose(out3, reference_forward(x3, params), atol=1e-1, rtol=1e-1)

    print("KERNEL_OK")
</pallas_src>

<mosaic_0001>
module attributes {stable_mosaic.version = 11 : i64} {
  func.func @mlp_kernel(%arg0: i32, %arg1: memref<8x128xf32, #tpu.memory_space<vmem>>, %arg2: memref<128x128xf32, #tpu.memory_space<vmem>>, %arg3: memref<1x128xf32, #tpu.memory_space<vmem>>, %arg4: memref<128x128xf32, #tpu.memory_space<vmem>>, %arg5: memref<1x128xf32, #tpu.memory_space<vmem>>, %arg6: memref<128x128xf32, #tpu.memory_space<vmem>>, %arg7: memref<1x128xf32, #tpu.memory_space<vmem>>, %arg8: memref<8x10xf32, #tpu.memory_space<vmem>>) attributes {dimension_semantics = [#tpu.dimension_semantics<parallel>], iteration_bounds = array<i64: 1>, scalar_prefetch = 0 : i64, scratch_operands = 0 : i64, tpu.core_type = #tpu.core_type<tc>, window_params = [{transform_indices = @transform_0, window_bounds = array<i64: 8, 128>}, {pipeline_mode = #tpu.pipeline_mode<synchronous>, transform_indices = @transform_1, window_bounds = array<i64: 128, 128>}, {pipeline_mode = #tpu.pipeline_mode<synchronous>, transform_indices = @transform_2, window_bounds = array<i64: 1, 128>}, {pipeline_mode = #tpu.pipeline_mode<synchronous>, transform_indices = @transform_3, window_bounds = array<i64: 128, 128>}, {pipeline_mode = #tpu.pipeline_mode<synchronous>, transform_indices = @transform_4, window_bounds = array<i64: 1, 128>}, {pipeline_mode = #tpu.pipeline_mode<synchronous>, transform_indices = @transform_5, window_bounds = array<i64: 128, 128>}, {pipeline_mode = #tpu.pipeline_mode<synchronous>, transform_indices = @transform_6, window_bounds = array<i64: 1, 128>}, {transform_indices = @transform_7, window_bounds = array<i64: 8, 10>}]} {
    %c0 = arith.constant 0 : index
    %c0_0 = arith.constant 0 : index
    %0 = vector.load %arg1[%c0, %c0_0] : memref<8x128xf32, #tpu.memory_space<vmem>>, vector<8x128xf32>
    %c0_1 = arith.constant 0 : index
    %c0_2 = arith.constant 0 : index
    %1 = vector.load %arg2[%c0_1, %c0_2] : memref<128x128xf32, #tpu.memory_space<vmem>>, vector<128x128xf32>
    %cst = arith.constant dense<0.000000e+00> : vector<8x128xf32>
    %2 = tpu.matmul %0, %1, %cst {dimension_numbers = #tpu.dot_dimension_numbers<[1], [0], [0], [1], [0, 0, 1, 1], [], []>} : vector<8x128xf32>, vector<128x128xf32>, vector<8x128xf32> -> vector<8x128xf32>
    %c0_3 = arith.constant 0 : index
    %c0_4 = arith.constant 0 : index
    %3 = vector.load %arg3[%c0_3, %c0_4] : memref<1x128xf32, #tpu.memory_space<vmem>>, vector<1x128xf32>
    %4 = vector.broadcast %3 : vector<1x128xf32> to vector<8x128xf32>
    %5 = arith.addf %2, %4 : vector<8x128xf32>
    %cst_5 = arith.constant 0.000000e+00 : f32
    %6 = vector.broadcast %cst_5 : f32 to vector<8x128xf32>
    %7 = arith.maximumf %5, %6 : vector<8x128xf32>
    %c0_6 = arith.constant 0 : index
    %c0_7 = arith.constant 0 : index
    %8 = vector.load %arg4[%c0_6, %c0_7] : memref<128x128xf32, #tpu.memory_space<vmem>>, vector<128x128xf32>
    %cst_8 = arith.constant dense<0.000000e+00> : vector<8x128xf32>
    %9 = tpu.matmul %7, %8, %cst_8 {dimension_numbers = #tpu.dot_dimension_numbers<[1], [0], [0], [1], [0, 0, 1, 1], [], []>} : vector<8x128xf32>, vector<128x128xf32>, vector<8x128xf32> -> vector<8x128xf32>
    %c0_9 = arith.constant 0 : index
    %c0_10 = arith.constant 0 : index
    %10 = vector.load %arg5[%c0_9, %c0_10] : memref<1x128xf32, #tpu.memory_space<vmem>>, vector<1x128xf32>
    %11 = vector.broadcast %10 : vector<1x128xf32> to vector<8x128xf32>
    %12 = arith.addf %9, %11 : vector<8x128xf32>
    %cst_11 = arith.constant 0.000000e+00 : f32
    %13 = vector.broadcast %cst_11 : f32 to vector<8x128xf32>
    %14 = arith.maximumf %12, %13 : vector<8x128xf32>
    %c0_12 = arith.constant 0 : index
    %c0_13 = arith.constant 0 : index
    %15 = vector.load %arg6[%c0_12, %c0_13] : memref<128x128xf32, #tpu.memory_space<vmem>>, vector<128x128xf32>
    %cst_14 = arith.constant dense<0.000000e+00> : vector<8x128xf32>
    %16 = tpu.matmul %14, %15, %cst_14 {dimension_numbers = #tpu.dot_dimension_numbers<[1], [0], [0], [1], [0, 0, 1, 1], [], []>} : vector<8x128xf32>, vector<128x128xf32>, vector<8x128xf32> -> vector<8x128xf32>
    %c0_15 = arith.constant 0 : index
    %c0_16 = arith.constant 0 : index
    %17 = vector.load %arg7[%c0_15, %c0_16] : memref<1x128xf32, #tpu.memory_space<vmem>>, vector<1x128xf32>
    %18 = vector.broadcast %17 : vector<1x128xf32> to vector<8x128xf32>
    %19 = arith.addf %16, %18 : vector<8x128xf32>
    %20 = vector.extract_strided_slice %19 {offsets = [0, 0], sizes = [8, 10], strides = [1, 1]} : vector<8x128xf32> to vector<8x10xf32>
    %c0_17 = arith.constant 0 : index
    %c0_18 = arith.constant 0 : index
    %21 = vector.load %arg8[%c0_17, %c0_18] : memref<8x10xf32, #tpu.memory_space<vmem>>, vector<8x10xf32>
    tpu.vector_store %arg8[%c0_17, %c0_18], %20 {strides = array<i32>} : memref<8x10xf32, #tpu.memory_space<vmem>>, vector<8x10xf32>,
    return
  }
  func.func @transform_0(%arg0: i32) -> (i32, i32) {
    %c0_i32 = arith.constant 0 : i32
    %c0_i32_0 = arith.constant 0 : i32
    return %arg0, %c0_i32 : i32, i32
  }
  func.func @transform_1(%arg0: i32) -> (i32, i32) {
    %c0_i32 = arith.constant 0 : i32
    %c0_i32_0 = arith.constant 0 : i32
    %c0_i32_1 = arith.constant 0 : i32
    return %c0_i32, %c0_i32_0 : i32, i32
  }
  func.func @transform_2(%arg0: i32) -> (i32, i32) {
    %c0_i32 = arith.constant 0 : i32
    %c0_i32_0 = arith.constant 0 : i32
    %c0_i32_1 = arith.constant 0 : i32
    return %c0_i32, %c0_i32_0 : i32, i32
  }
  func.func @transform_3(%arg0: i32) -> (i32, i32) {
    %c0_i32 = arith.constant 0 : i32
    %c0_i32_0 = arith.constant 0 : i32
    %c0_i32_1 = arith.constant 0 : i32
    return %c0_i32, %c0_i32_0 : i32, i32
  }
  func.func @transform_4(%arg0: i32) -> (i32, i32) {
    %c0_i32 = arith.constant 0 : i32
    %c0_i32_0 = arith.constant 0 : i32
    %c0_i32_1 = arith.constant 0 : i32
    return %c0_i32, %c0_i32_0 : i32, i32
  }
  func.func @transform_5(%arg0: i32) -> (i32, i32) {
    %c0_i32 = arith.constant 0 : i32
    %c0_i32_0 = arith.constant 0 : i32
    %c0_i32_1 = arith.constant 0 : i32
    return %c0_i32, %c0_i32_0 : i32, i32
  }
  func.func @transform_6(%arg0: i32) -> (i32, i32) {
    %c0_i32 = arith.constant 0 : i32
    %c0_i32_0 = arith.constant 0 : i32
    %c0_i32_1 = arith.constant 0 : i32
    return %c0_i32, %c0_i32_0 : i32, i32
  }
  func.func @transform_7(%arg0: i32) -> (i32, i32) {
    %c0_i32 = arith.constant 0 : i32
    %c0_i32_0 = arith.constant 0 : i32
    return %arg0, %c0_i32 : i32, i32
  }
}

</mosaic_0001>

<bundles_post_ra>
// kernel: tpu_custom_call.1
= control target key start
LH: loop header
LB: loop body
LE: loop exit
PB: predicated region body
PF: predicated region fallthrough
CT: control target
= control target key end

     0   :  { %12 = vsyncpa [#allocation3], 0  ;;  %s793_s0 = inlined_call_operand.hbm [shape: f32[8,128], index: 0, kind: input, shape index: {}]   ;;  %s794_s1 = inlined_call_operand.hbm [shape: f32[128,128], index: 1, kind: input, shape index: {}]   ;;  %s795_s2 = inlined_call_operand.vmem [shape: f32[1,128], index: 2, kind: input, shape index: {}]   ;;  %s796_s3 = inlined_call_operand.hbm [shape: f32[128,128], index: 3, kind: input, shape index: {}]   ;;  %s797_s4 = inlined_call_operand.vmem [shape: f32[1,128], index: 4, kind: input, shape index: {}]   ;;  %s798_s5 = inlined_call_operand.hbm [shape: f32[128,128], index: 5, kind: input, shape index: {}]   ;;  %s799_s6 = inlined_call_operand.vmem [shape: f32[1,128], index: 6, kind: input, shape index: {}]   ;;  %s800_s7 = inlined_call_operand.hbm [shape: f32[8,10], index: 7, kind: output, shape index: {}]  }
   0x1   :  { %13 = vsyncpa [#allocation6], 0 }
   0x2   :  { %14 = vsyncpa [#allocation9], 0 }
   0x3   :  { %15 = vsyncpa [#allocation4], 0  ;;  %s657_s24 = smov [#allocation5]  }
   0x4   :  { %s31_s25 = sshll.u32 %s657_s24, 4  ;;  %s32_s25 = int_to_ptr.vmem [resolvable:$true] %s31_s25 }
   0x5   :  { %s557_s26 = scalar_lea.vmem %s32_s25, 2048  ;;  %p562_p1 = scmp.lt.s32.totalorder %s32_s25, %s32_s25 }
   0x6   :  { %p558_p0 = scmp.ne.s32.totalorder %s32_s25, %s557_s26  ;;  %p563_p2 = scmp.lt.s32.totalorder %s557_s26, %s557_s26 }
   0x8   :  { %p564_p3 = por %p563_p2, %p562_p1 }
   0xa   :  { %p565_p4 = pnand %p564_p3, %p558_p0 }
   0xc   :  { %568 = shalt.err (!%p565_p4)
}
   0xd   :  { %s658_s27 = smov 128   ;;  %s659_s28 = smov 8  }
   0xe   :  { %37 = dma.hbm_to_vmem [thread:$0]  %s794_s1, 2048, %s32_s25, [#allocation6], %s658_s27, %s658_s27, %s659_s28  }
   0xf   :  { %s660_s8 = smov [#allocation2]   ;;  %s661_s10 = smov [#allocation7]  }
  0x10   :  { %s22_s9 = sshll.u32 %s660_s8, 4  ;;  %s45_s11 = sshll.u32 %s661_s10, 4  ;;  %s23_s9 = int_to_ptr.vmem [resolvable:$true] %s22_s9  ;;  %s46_s11 = int_to_ptr.vmem [resolvable:$true] %s45_s11 }
  0x11   :  { %s577_s12 = scalar_lea.vmem %s23_s9, 128  ;;  %p582_p6 = scmp.lt.s32.totalorder %s23_s9, %s23_s9 }
  0x12   :  { %p578_p5 = scmp.ne.s32.totalorder %s23_s9, %s577_s12  ;;  %p583_p7 = scmp.lt.s32.totalorder %s577_s12, %s577_s12 }
  0x14   :  { %p584_p8 = por %p583_p7, %p582_p6 }
  0x16   :  { %p585_p9 = pnand %p584_p8, %p578_p5 }
  0x18   :  { %588 = shalt.err (!%p585_p9)
}
  0x19   :  { %25 = dma.hbm_to_vmem [thread:$0]  %s793_s0, 128, %s23_s9, [#allocation3]  }
  0x1a   :  { %s597_s15 = scalar_lea.vmem %s46_s11, 2048  ;;  %p602_p11 = scmp.lt.s32.totalorder %s46_s11, %s46_s11 }
  0x1b   :  { %p598_p10 = scmp.ne.s32.totalorder %s46_s11, %s597_s15  ;;  %p603_p12 = scmp.lt.s32.totalorder %s597_s15, %s597_s15 }
  0x1d   :  { %p604_p13 = por %p603_p12, %p602_p11 }
  0x1f   :  { %p605_p0 = pnand %p604_p13, %p598_p10 }
  0x21   :  { %608 = shalt.err (!%p605_p0)
}
  0x22   :  { %51 = dma.hbm_to_vmem [thread:$0]  %s796_s3, 2048, %s46_s11, [#allocation6], %s658_s27, %s658_s27, %s659_s28  }
  0x23   :  { %s662_s17 = smov [#allocation8]  }
  0x24   :  { %s59_s18 = sshll.u32 %s662_s17, 4  ;;  %s60_s18 = int_to_ptr.vmem [resolvable:$true] %s59_s18 }
  0x25   :  { %s617_s19 = scalar_lea.vmem %s60_s18, 2048  ;;  %p622_p2 = scmp.lt.s32.totalorder %s60_s18, %s60_s18 }
  0x26   :  { %p618_p1 = scmp.ne.s32.totalorder %s60_s18, %s617_s19  ;;  %p623_p3 = scmp.lt.s32.totalorder %s617_s19, %s617_s19 }
  0x28   :  { %p624_p4 = por %p623_p3, %p622_p2 }
  0x2a   :  { %p625_p5 = pnand %p624_p4, %p618_p1 }
  0x2c   :  { %628 = shalt.err (!%p625_p5)
}
  0x2d   :  { %65 = dma.hbm_to_vmem [thread:$0]  %s798_s5, 2048, %s60_s18, [#allocation9], %s658_s27, %s658_s27, %s659_s28  }
  0x2e   :  { %649 = dma.done.wait [#allocation3], 128  }
  0x2f   :  { %650 = vsyncadd [#allocation3], 4294967168 }
  0x30   :  { %651 = dma.done.wait [#allocation6], 4096  }
  0x31   :  { %652 = vsyncadd [#allocation6], 4294963200 }
  0x32   :  { %653 = dma.done.wait [#allocation9], 2048  }
  0x33   :  { %654 = vsyncadd [#allocation9], 4294965248  ;;  %v663_v0 = vmov 0.0   ;;  %vm664_vm0 = vmmov 0   ;;  %v96_v1 = vld [vmem:[#allocation5 + $0x78] sm:$0xff]  ;;  %v95_v2 = vld [vmem:[#allocation5 + $0x70] sm:$0xff] }
  0x34   :  { %435 = vmatprep.subr.mxu0 %v663_v0  ;;  %467 = vmatprep.mubr.msk.f32.mxu0 %vm664_vm0, %v663_v0  ;;  %v94_v3 = vld [vmem:[#allocation5 + $0x68] sm:$0xff]  ;;  %v93_v4 = vld [vmem:[#allocation5 + $0x60] sm:$0xff]  ;;  %v190_v5 = vld [vmem:[#allocation7 + $0x78] sm:$0xff]  ;;  %s665_s24 = smov [#allocation10]   ;;  %vm362_vm1 = vcmask 80896  }
  0x35   :  { %470 = vmatprep.subr.mxu1 %v663_v0  ;;  %502 = vmatprep.mubr.msk.f32.mxu1 %vm664_vm0, %v663_v0  ;;  %v92_v6 = vld [vmem:[#allocation5 + $0x58] sm:$0xff]  ;;  %v189_v7 = vld [vmem:[#allocation7 + $0x70] sm:$0xff]  ;;  %v188_v8 = vld [vmem:[#allocation7 + $0x68] sm:$0xff]  ;;  %s370_s25 = sshll.u32 %s665_s24, 4  ;;  %s371_s25 = int_to_ptr.vmem [resolvable:$true] %s370_s25 }
  0x36   :  { %436 = vmatpush3.msra.mxu0 %v96_v1  ;;  %471 = vmatpush3.msra.mxu1 %v190_v5  ;;  %v91_v9 = vld [vmem:[#allocation5 + $0x50] sm:$0xff]  ;;  %v187_v10 = vld [vmem:[#allocation7 + $0x60] sm:$0xff]  ;;  %v90_v11 = vld [vmem:[#allocation5 + $0x48] sm:$0xff]  ;;  %s629_s26 = scalar_lea.vmem %s371_s25, 128  ;;  %p634_p7 = scmp.lt.s32.totalorder %s371_s25, %s371_s25 }
  0x37   :  { %437 = vmatprep.subr.mxu0 %v663_v0  ;;  %472 = vmatprep.subr.mxu1 %v663_v0  ;;  %v186_v12 = vld [vmem:[#allocation7 + $0x58] sm:$0xff]  ;;  %v89_v13 = vld [vmem:[#allocation5 + $0x40] sm:$0xff]  ;;  %v185_v14 = vld [vmem:[#allocation7 + $0x50] sm:$0xff]  ;;  %p630_p6 = scmp.ne.s32.totalorder %s371_s25, %s629_s26  ;;  %p635_p8 = scmp.lt.s32.totalorder %s629_s26, %s629_s26 }
  0x38   :  { %438 = vmatpush3.msra.mxu0 %v95_v2  ;;  %473 = vmatpush3.msra.mxu1 %v189_v7  ;;  %v88_v15 = vld [vmem:[#allocation5 + $0x38] sm:$0xff]  ;;  %v184_v16 = vld [vmem:[#allocation7 + $0x48] sm:$0xff]  ;;  %v87_v17 = vld [vmem:[#allocation5 + $0x30] sm:$0xff] }
  0x39   :  { %439 = vmatprep.subr.mxu0 %v663_v0  ;;  %474 = vmatprep.subr.mxu1 %v663_v0  ;;  %v183_v18 = vld [vmem:[#allocation7 + $0x40] sm:$0xff]  ;;  %v86_v19 = vld [vmem:[#allocation5 + $0x28] sm:$0xff]  ;;  %v182_v20 = vld [vmem:[#allocation7 + $0x38] sm:$0xff]  ;;  %p636_p9 = por %p635_p8, %p634_p7 }
  0x3a   :  { %440 = vmatpush3.msra.mxu0 %v94_v3  ;;  %475 = vmatpush3.msra.mxu1 %v188_v8  ;;  %v85_v21 = vld [vmem:[#allocation5 + $0x20] sm:$0xff]  ;;  %v181_v22 = vld [vmem:[#allocation7 + $0x30] sm:$0xff]  ;;  %v84_v23 = vld [vmem:[#allocation5 + $0x18] sm:$0xff] }
  0x3b   :  { %441 = vmatprep.subr.mxu0 %v663_v0  ;;  %476 = vmatprep.subr.mxu1 %v663_v0  ;;  %v180_v24 = vld [vmem:[#allocation7 + $0x28] sm:$0xff]  ;;  %v83_v25 = vld [vmem:[#allocation5 + $0x10] sm:$0xff]  ;;  %v179_v26 = vld [vmem:[#allocation7 + $0x20] sm:$0xff]  ;;  %p637_p10 = pnand %p636_p9, %p630_p6 }
  0x3c   :  { %442 = vmatpush3.msra.mxu0 %v93_v4  ;;  %477 = vmatpush3.msra.mxu1 %v187_v10  ;;  %v82_v27 = vld [vmem:[#allocation5 + $0x8] sm:$0xff]  ;;  %v178_v28 = vld [vmem:[#allocation7 + $0x18] sm:$0xff]  ;;  %v81_v29 = vld [vmem:[#allocation5] sm:$0xff] }
  0x3d   :  { %443 = vmatprep.subr.mxu0 %v663_v0  ;;  %478 = vmatprep.subr.mxu1 %v663_v0  ;;  %v80_v30 = vld [vmem:[#allocation2] sm:$0xff]  ;;  %v177_v31 = vld [vmem:[#allocation7 + $0x10] sm:$0xff]  ;;  %v176_v32 = vld [vmem:[#allocation7 + $0x8] sm:$0xff] }
  0x3e   :  { %444 = vmatpush3.msra.mxu0 %v92_v6  ;;  %479 = vmatpush3.msra.mxu1 %v186_v12  ;;  %v175_v33 = vld [vmem:[#allocation7] sm:$0xff]  ;;  %v284_v34 = vld [vmem:[#allocation8 + $0x78] sm:$0xff]  ;;  %v283_v35 = vld [vmem:[#allocation8 + $0x70] sm:$0xff] }
  0x3f   :  { %445 = vmatprep.subr.mxu0 %v663_v0  ;;  %480 = vmatprep.subr.mxu1 %v663_v0  ;;  %v282_v36 = vld [vmem:[#allocation8 + $0x68] sm:$0xff]  ;;  %v281_v37 = vld [vmem:[#allocation8 + $0x60] sm:$0xff]  ;;  %v280_v38 = vld [vmem:[#allocation8 + $0x58] sm:$0xff] }
  0x40   :  { %446 = vmatpush3.msra.mxu0 %v91_v9  ;;  %481 = vmatpush3.msra.mxu1 %v185_v14  ;;  %v279_v39 = vld [vmem:[#allocation8 + $0x50] sm:$0xff]  ;;  %v278_v40 = vld [vmem:[#allocation8 + $0x48] sm:$0xff]  ;;  %v277_v41 = vld [vmem:[#allocation8 + $0x40] sm:$0xff] }
  0x41   :  { %447 = vmatprep.subr.mxu0 %v663_v0  ;;  %482 = vmatprep.subr.mxu1 %v663_v0  ;;  %v276_v42 = vld [vmem:[#allocation8 + $0x38] sm:$0xff]  ;;  %v275_v43 = vld [vmem:[#allocation8 + $0x30] sm:$0xff]  ;;  %v274_v44 = vld [vmem:[#allocation8 + $0x28] sm:$0xff] }
  0x42   :  { %448 = vmatpush3.msra.mxu0 %v90_v11  ;;  %483 = vmatpush3.msra.mxu1 %v184_v16  ;;  %v273_v45 = vld [vmem:[#allocation8 + $0x20] sm:$0xff]  ;;  %v272_v46 = vld [vmem:[#allocation8 + $0x18] sm:$0xff]  ;;  %v271_v52 = vld [vmem:[#allocation8 + $0x10] sm:$0xff] }
  0x43   :  { %449 = vmatprep.subr.mxu0 %v663_v0  ;;  %484 = vmatprep.subr.mxu1 %v663_v0  ;;  %v381_v47 = vld [vmem:[%s795_s2] ss:$0 sm:$0xff]  ;;  %v270_v53 = vld [vmem:[#allocation8 + $0x8] sm:$0xff]  ;;  %v269_v54 = vld [vmem:[#allocation8] sm:$0xff] }
  0x44   :  { %450 = vmatpush3.msra.mxu0 %v89_v13  ;;  %485 = vmatpush3.msra.mxu1 %v183_v18  ;;  %v382_v55 = vld [vmem:[%s797_s4] ss:$0 sm:$0xff] }
  0x45   :  { %451 = vmatprep.subr.mxu0 %v663_v0  ;;  %486 = vmatprep.subr.mxu1 %v663_v0  ;;  %v383_v60 = vld [vmem:[%s799_s6] ss:$0 sm:$0xff] }
  0x46   :  { %452 = vmatpush3.msra.mxu0 %v88_v15  ;;  %487 = vmatpush3.msra.mxu1 %v182_v20 }
  0x47   :  { %453 = vmatprep.subr.mxu0 %v663_v0  ;;  %488 = vmatprep.subr.mxu1 %v663_v0 }
  0x48   :  { %454 = vmatpush3.msra.mxu0 %v87_v17  ;;  %489 = vmatpush3.msra.mxu1 %v181_v22 }
  0x49   :  { %455 = vmatprep.subr.mxu0 %v663_v0  ;;  %490 = vmatprep.subr.mxu1 %v663_v0 }
  0x4a   :  { %456 = vmatpush3.msra.mxu0 %v86_v19  ;;  %491 = vmatpush3.msra.mxu1 %v180_v24 }
  0x4b   :  { %457 = vmatprep.subr.mxu0 %v663_v0  ;;  %492 = vmatprep.subr.mxu1 %v663_v0 }
  0x4c   :  { %458 = vmatpush3.msra.mxu0 %v85_v21  ;;  %493 = vmatpush3.msra.mxu1 %v179_v26 }
  0x4d   :  { %459 = vmatprep.subr.mxu0 %v663_v0  ;;  %494 = vmatprep.subr.mxu1 %v663_v0 }
  0x4e   :  { %460 = vmatpush3.msra.mxu0 %v84_v23  ;;  %495 = vmatpush3.msra.mxu1 %v178_v28 }
  0x4f   :  { %461 = vmatprep.subr.mxu0 %v663_v0  ;;  %496 = vmatprep.subr.mxu1 %v663_v0 }
  0x50   :  { %462 = vmatpush3.msra.mxu0 %v83_v25  ;;  %497 = vmatpush3.msra.mxu1 %v177_v31 }
  0x51   :  { %463 = vmatprep.subr.mxu0 %v663_v0  ;;  %498 = vmatprep.subr.mxu1 %v663_v0 }
  0x52   :  { %464 = vmatpush3.msra.mxu0 %v82_v27  ;;  %499 = vmatpush3.msra.mxu1 %v176_v32 }
  0x53   :  { %465 = vmatprep.subr.mxu0 %v663_v0  ;;  %500 = vmatprep.subr.mxu1 %v663_v0 }
  0x54   :  { %466 = vmatpush3.msra.mxu0 %v81_v29  ;;  %501 = vmatpush3.msra.mxu1 %v175_v33 }
  0x55   :  { %468 = vmatmul.mubr.f32.vlgmr.msra.gmra.mxu0 %v80_v30  ;;  %505 = vmatprep.subr.mxu0 %v663_v0 }
  0x56   :  { %537 = vmatprep.mubr.msk.f32.mxu0 %vm664_vm0, %v663_v0  ;;  %506 = vmatpush3.msra.mxu0 %v284_v34 }
  0x57   :  { %507 = vmatprep.subr.mxu0 %v663_v0 }
  0x58   :  { %508 = vmatpush3.msra.mxu0 %v283_v35 }
  0x59   :  { %509 = vmatprep.subr.mxu0 %v663_v0 }
  0x5a   :  { %510 = vmatpush3.msra.mxu0 %v282_v36 }
  0x5b   :  { %511 = vmatprep.subr.mxu0 %v663_v0 }
  0x5c   :  { %512 = vmatpush3.msra.mxu0 %v281_v37 }
  0x5d   :  { %513 = vmatprep.subr.mxu0 %v663_v0 }
  0x5e   :  { %514 = vmatpush3.msra.mxu0 %v280_v38 }
  0x5f   :  { %515 = vmatprep.subr.mxu0 %v663_v0 }
  0x60   :  { %516 = vmatpush3.msra.mxu0 %v279_v39 }
  0x61   :  { %517 = vmatprep.subr.mxu0 %v663_v0 }
  0x62   :  { %518 = vmatpush3.msra.mxu0 %v278_v40 }
  0x63   :  { %519 = vmatprep.subr.mxu0 %v663_v0 }
  0x64   :  { %520 = vmatpush3.msra.mxu0 %v277_v41 }
  0x65   :  { %521 = vmatprep.subr.mxu0 %v663_v0 }
  0x66   :  { %522 = vmatpush3.msra.mxu0 %v276_v42 }
  0x67   :  { %523 = vmatprep.subr.mxu0 %v663_v0 }
  0x68   :  { %524 = vmatpush3.msra.mxu0 %v275_v43 }
  0x69   :  { %525 = vmatprep.subr.mxu0 %v663_v0 }
  0x6a   :  { %526 = vmatpush3.msra.mxu0 %v274_v44 }
  0x6b   :  { %527 = vmatprep.subr.mxu0 %v663_v0 }
  0x6c   :  { %528 = vmatpush3.msra.mxu0 %v273_v45 }
  0x6d   :  { %529 = vmatprep.subr.mxu0 %v663_v0 }
  0x6e   :  { %530 = vmatpush3.msra.mxu0 %v272_v46 }
  0x6f   :  { %531 = vmatprep.subr.mxu0 %v663_v0 }
  0x70   :  { %532 = vmatpush3.msra.mxu0 %v271_v52 }
  0x71   :  { %533 = vmatprep.subr.mxu0 %v663_v0 }
  0x72   :  { %534 = vmatpush3.msra.mxu0 %v270_v53 }
  0x73   :  { %535 = vmatprep.subr.mxu0 %v663_v0 }
  0x74   :  { %536 = vmatpush3.msra.mxu0 %v269_v54 }
 0x115   :  { %v170_v48 = vpop.f32.mrf.mxu0 }
 0x116   :  { %v171_v49 = vadd.f32 %v381_v47, %v170_v48 }
 0x117   :  { %v469_v50 = vpop.f32.mrf.mxu0 }
 0x118   :  { %v174_v51 = vmax.f32 %v171_v49, 0.0 }
 0x11a   :  { %503 = vmatmul.mubr.f32.vlgmr.msra.gmra.mxu1 %v174_v51 }
 0x1da   :  { %v264_v56 = vpop.f32.mrf.mxu1 }
 0x1db   :  { %v265_v57 = vadd.f32 %v382_v55, %v264_v56 }
 0x1dc   :  { %v504_v58 = vpop.f32.mrf.mxu1 }
 0x1dd   :  { %v268_v59 = vmax.f32 %v265_v57, 0.0 }
 0x1df   :  { %538 = vmatmul.mubr.f32.vlgmr.msra.gmra.mxu0 %v268_v59 }
 0x29f   :  { %v358_v61 = vpop.f32.mrf.mxu0 }
 0x2a0   :  { %v359_v62 = vadd.f32 %v383_v60, %v358_v61 }
 0x2a1   :  { %v539_v63 = vpop.f32.mrf.mxu0 }
 0x2a2   :  { %363 = vst.msk [vmem:[#allocation10] sm:$0xff] %vm362_vm1, %v359_v62 }
 0x2a3   :  { %640 = shalt.err (!%p637_p10)
}
 0x2a4   :  { %373 = dma.vmem_to_hbm [thread:$0]  %s371_s25, 128, %s800_s7, [#allocation4]  }
 0x2a5   :  { %655 = dma.done.wait [#allocation4], 128  }
 0x2a6   :  { %656 = vsyncadd [#allocation4], 4294967168 }
 0x2a7   :  { %377 = vsyncpa [#allocation3], 1 }
 0x2a8   :  { %378 = vsyncpa [#allocation6], 1 }
 0x2a9   :  { %379 = vsyncpa [#allocation9], 1 }
 0x2aa   :  { %380 = vsyncpa [#allocation4], 1 }

</bundles_post_ra>
